<compile_context>
chip_gen: v7x
topology: tpu7x:2x2x1
jax: 0.10.0
libtpu: 0.0.40
codegen_flags: <defaults>
</compile_context>

<pallas_src>
import jax
import jax.numpy as jnp
from jax.experimental import pallas as pl
from jax.experimental.pallas import tpu as pltpu

TEMPERATURE = 0.2
INV_T = 1.0 / TEMPERATURE
COS_EPS = 1e-8  # torch.cosine_similarity default eps


def _make_infonce_kernel(num_pos, batch_total):
    """Kernel factory: num_pos / batch size are static Python ints."""
    inv_batch = 1.0 / float(batch_total)

    def kernel(pred_ref, lab_ref, x_ref, kn_ref, w_ref, out_ref,
               acc_sse_ref, acc_ratio_ref):
        step = pl.program_id(0)

        @pl.when(step == 0)
        def _init():
            acc_sse_ref[...] = jnp.zeros_like(acc_sse_ref)
            acc_ratio_ref[...] = jnp.zeros_like(acc_ratio_ref)

        # ---- MSE partial: sum of squared errors over this batch tile ------
        pred = pred_ref[...].astype(jnp.float32)              # (TB, 1)
        lab = lab_ref[...][:, 0:1].astype(jnp.float32)        # label[:, 0:1]
        diff = pred - lab
        sse = jnp.sum(diff * diff)

        # ---- Weighted InfoNCE partial --------------------------------------
        x_in = x_ref[...]                                     # (TB, F) native dtype
        kn_in = kn_ref[...]                                   # (TB, K, F) native dtype
        w = w_ref[...].astype(jnp.float32)                    # (TB, K)

        # Cosine numerator: batched F-contraction on the MXU, f32 accumulate.
        dots3 = jnp.einsum('bqf,bkf->bqk', x_in[:, None, :], kn_in,
                           preferred_element_type=jnp.float32)  # (TB, 1, K)
        dots = dots3[:, 0, :]                                   # (TB, K)

        # Norms / epilogue stay in f32 on the VPU/XLU/EUP.
        x32 = x_in.astype(jnp.float32)
        kn32 = kn_in.astype(jnp.float32)
        x_norm = jnp.sqrt(jnp.sum(x32 * x32, axis=-1, keepdims=True))   # (TB, 1)
        kn_norm = jnp.sqrt(jnp.sum(kn32 * kn32, axis=-1))               # (TB, K)

        sim = dots / jnp.maximum(x_norm * kn_norm, COS_EPS)             # (TB, K)
        sim = sim * w        # weight columns are 1.0 for the positive samples
        e = jnp.exp(sim * INV_T)                                        # (TB, K)

        col = jax.lax.broadcasted_iota(jnp.int32, e.shape, 1)
        nom = jnp.sum(jnp.where(col < num_pos, e, 0.0),
                      axis=-1, keepdims=True)                           # (TB, 1)
        den = jnp.sum(e, axis=-1, keepdims=True)                        # (TB, 1)

        acc_sse_ref[...] += jnp.broadcast_to(sse, (1, 1))
        acc_ratio_ref[...] += jnp.broadcast_to(jnp.sum(nom / den), (1, 1))

        @pl.when(step == pl.num_programs(0) - 1)
        def _finalize():
            mse = acc_sse_ref[...] * jnp.float32(inv_batch)
            info_nce = -jnp.log(acc_ratio_ref[...] * jnp.float32(inv_batch))
            out_ref[...] = mse + info_nce

    return kernel


def _pick_batch_tile(batch, max_tile):
    """Largest power-of-two multiple of 8 that divides batch (capped), else the
    whole batch as a single block (small / ragged batches)."""
    if batch % 8 != 0:
        return batch
    tb = 8
    while tb * 2 <= max_tile and batch % (tb * 2) == 0:
        tb *= 2
    return tb


def mse_contrastive_loss(predict, label, x, pos, neg, neg_weight, *,
                         max_batch_tile=256):
    """Equivalent of MSEContrastiveLoss(contrastive='InfoNCE').forward with the
    contrastive arguments provided. Returns a scalar f32."""
    batch, num_pos, feat = pos.shape
    num_neg = neg.shape[1]
    k = num_pos + num_neg

    # One dense (B, K, F) slab: positives first, then negatives; weights are 1
    # for positive columns so one exp/sum pass covers nominator + denominator.
    kn = jnp.concatenate([pos, neg], axis=1)                              # (B,K,F)
    w_all = jnp.concatenate(
        [jnp.ones((batch, num_pos), neg_weight.dtype), neg_weight], axis=1)

    tb = _pick_batch_tile(batch, max_batch_tile)
    grid = (batch // tb,)

    out = pl.pallas_call(
        _make_infonce_kernel(num_pos, batch),
        out_shape=jax.ShapeDtypeStruct((1, 1), jnp.float32),
        grid_spec=pltpu.PrefetchScalarGridSpec(
            num_scalar_prefetch=0,
            grid=grid,
            in_specs=[
                pl.BlockSpec((tb, 1), lambda i: (i, 0)),                # predict
                pl.BlockSpec((tb, label.shape[1]), lambda i: (i, 0)),   # label
                pl.BlockSpec((tb, feat), lambda i: (i, 0)),             # x
                pl.BlockSpec((tb, k, feat), lambda i: (i, 0, 0)),       # pos|neg
                pl.BlockSpec((tb, k), lambda i: (i, 0)),                # weights
            ],
            out_specs=pl.BlockSpec((1, 1), lambda i: (0, 0)),
            scratch_shapes=[pltpu.VMEM((1, 1), jnp.float32),
                            pltpu.VMEM((1, 1), jnp.float32)],
        ),
        compiler_params=pltpu.CompilerParams(
            dimension_semantics=("arbitrary",)),
    )(predict, label, x, kn, w_all)
    return out[0, 0]


def _mse_only_kernel(pred_ref, lab_ref, out_ref):
    diff = pred_ref[...].astype(jnp.float32) - lab_ref[...].astype(jnp.float32)
    out_ref[...] = jnp.broadcast_to(
        jnp.sum(diff * diff) / jnp.float32(diff.size), (1, 1))


def mse_loss_only(predict, label):
    """Path taken when x/pos/neg are None: plain MSE(predict, label)."""
    vmem = pl.BlockSpec(memory_space=pltpu.MemorySpace.VMEM)
    out = pl.pallas_call(
        _mse_only_kernel,
        out_shape=jax.ShapeDtypeStruct((1, 1), jnp.float32),
        in_specs=[vmem, vmem],
        out_specs=vmem,
    )(predict, label)
    return out[0, 0]


def _reference(predict, label, x, pos, neg, neg_weight):
    # Pure-JAX reference mirroring the PyTorch forward (computed in f32).
    predict, label, x, pos, neg, neg_weight = (
        a.astype(jnp.float32) for a in (predict, label, x, pos, neg, neg_weight))
    lab = label[:, 0:1]
    mse = jnp.mean((predict - lab) ** 2)
    xn = jnp.linalg.norm(x, axis=-1, keepdims=True)
    pos_sim = jnp.sum(x[:, None, :] * pos, -1) / jnp.maximum(
        xn * jnp.linalg.norm(pos, axis=-1), COS_EPS)
    neg_sim = jnp.sum(x[:, None, :] * neg, -1) / jnp.maximum(
        xn * jnp.linalg.norm(neg, axis=-1), COS_EPS)
    neg_sim = neg_sim * neg_weight
    nom = jnp.sum(jnp.exp(pos_sim / TEMPERATURE), axis=-1)
    den = nom + jnp.sum(jnp.exp(neg_sim / TEMPERATURE), axis=-1)
    return mse + (-jnp.log(jnp.mean(nom / den)))


if __name__ == "__main__":
    # Shapes consistent with the module's forward signature.
    B, F, P, N, L = 16, 128, 2, 3, 4
    key = jax.random.PRNGKey(0)
    k1, k2, k3, k4, k5, k6 = jax.random.split(key, 6)

    predict = jax.random.normal(k1, (B, 1), jnp.float32)
    label = jax.random.normal(k2, (B, L), jnp.float32)
    x = jax.random.normal(k3, (B, F), jnp.float32)
    pos = jax.random.normal(k4, (B, P, F), jnp.float32)
    neg = jax.random.normal(k5, (B, N, F), jnp.float32)
    neg_weight = jax.random.uniform(k6, (B, N), jnp.float32)

    # f32 inputs, tiled over the batch (tile=8 -> 2 grid steps exercising the
    # init / accumulate / finalize path).  Tolerance is a few 1e-3 because the
    # MXU may evaluate the f32 contraction with multi-pass bf16 arithmetic.
    loss = mse_contrastive_loss(predict, label, x, pos, neg, neg_weight,
                                max_batch_tile=8)
    jax.block_until_ready(loss)
    ref = _reference(predict, label, x, pos, neg, neg_weight)
    assert jnp.allclose(loss, ref, rtol=5e-3, atol=5e-3), (loss, ref)

    # Small batch not a multiple of 8 -> single whole-batch block fallback.
    Bs = 4
    loss_s = mse_contrastive_loss(predict[:Bs], label[:Bs], x[:Bs], pos[:Bs],
                                  neg[:Bs], neg_weight[:Bs])
    jax.block_until_ready(loss_s)
    ref_s = _reference(predict[:Bs], label[:Bs], x[:Bs], pos[:Bs], neg[:Bs],
                       neg_weight[:Bs])
    assert jnp.allclose(loss_s, ref_s, rtol=5e-3, atol=5e-3), (loss_s, ref_s)

    # bf16 inputs: no wrapper upcast; MXU runs bf16 with f32 accumulation.
    bf = jnp.bfloat16
    loss_bf = mse_contrastive_loss(predict.astype(bf), label.astype(bf),
                                   x.astype(bf), pos.astype(bf),
                                   neg.astype(bf), neg_weight.astype(bf),
                                   max_batch_tile=8)
    jax.block_until_ready(loss_bf)
    ref_bf = _reference(predict.astype(bf), label.astype(bf), x.astype(bf),
                        pos.astype(bf), neg.astype(bf), neg_weight.astype(bf))
    assert jnp.allclose(loss_bf, ref_bf, rtol=1e-3, atol=1e-3), (loss_bf, ref_bf)

    # MSE-only path (x/pos/neg omitted in the module's forward).
    loss2 = mse_loss_only(predict, label[:, 0:1])
    jax.block_until_ready(loss2)
    assert jnp.allclose(loss2, jnp.mean((predict - label[:, 0:1]) ** 2),
                        rtol=1e-5, atol=1e-6)

    # TODO(synk): TripletLoss branch (contrastive='Triplet') not implemented;
    # the module defaults to InfoNCE and only that branch is exercised here.
    print("KERNEL_OK")
</pallas_src>

<mosaic_0001>
module attributes {stable_mosaic.version = 11 : i64} {
  func.func @kernel(%arg0: i32, %arg1: memref<8x1xf32, #tpu.memory_space<vmem>>, %arg2: memref<8x4xf32, #tpu.memory_space<vmem>>, %arg3: memref<8x128xf32, #tpu.memory_space<vmem>>, %arg4: memref<8x5x128xf32, #tpu.memory_space<vmem>>, %arg5: memref<8x5xf32, #tpu.memory_space<vmem>>, %arg6: memref<1x1xf32, #tpu.memory_space<vmem>>, %arg7: memref<1x1xf32, #tpu.memory_space<vmem>>, %arg8: memref<1x1xf32, #tpu.memory_space<vmem>>) attributes {dimension_semantics = [#tpu.dimension_semantics<arbitrary>], iteration_bounds = array<i64: 2>, scalar_prefetch = 0 : i64, scratch_operands = 2 : i64, tpu.core_type = #tpu.core_type<tc>, window_params = [{transform_indices = @transform_0, window_bounds = array<i64: 8, 1>}, {transform_indices = @transform_1, window_bounds = array<i64: 8, 4>}, {transform_indices = @transform_2, window_bounds = array<i64: 8, 128>}, {transform_indices = @transform_3, window_bounds = array<i64: 8, 5, 128>}, {transform_indices = @transform_4, window_bounds = array<i64: 8, 5>}, {pipeline_mode = #tpu.pipeline_mode<synchronous>, transform_indices = @transform_5, window_bounds = array<i64: 1, 1>}]} {
    %c0_i32 = arith.constant 0 : i32
    %0 = arith.cmpi eq, %arg0, %c0_i32 : i32
    %1 = arith.extui %0 : i1 to i32
    %c0_i32_0 = arith.constant 0 : i32
    %2 = arith.cmpi ne, %1, %c0_i32_0 : i32
    scf.if %2 {
      %cst_29 = arith.constant 0.000000e+00 : f32
      %59 = vector.broadcast %cst_29 : f32 to vector<1x1xf32>
      %c0_30 = arith.constant 0 : index
      %c0_31 = arith.constant 0 : index
      %60 = vector.load %arg7[%c0_30, %c0_31] : memref<1x1xf32, #tpu.memory_space<vmem>>, vector<1x1xf32>
      tpu.vector_store %arg7[%c0_30, %c0_31], %59 {strides = array<i32>} : memref<1x1xf32, #tpu.memory_space<vmem>>, vector<1x1xf32>,
      %cst_32 = arith.constant 0.000000e+00 : f32
      %61 = vector.broadcast %cst_32 : f32 to vector<1x1xf32>
      %c0_33 = arith.constant 0 : index
      %c0_34 = arith.constant 0 : index
      %62 = vector.load %arg8[%c0_33, %c0_34] : memref<1x1xf32, #tpu.memory_space<vmem>>, vector<1x1xf32>
      tpu.vector_store %arg8[%c0_33, %c0_34], %61 {strides = array<i32>} : memref<1x1xf32, #tpu.memory_space<vmem>>, vector<1x1xf32>,
    } else {
    }
    %c0 = arith.constant 0 : index
    %c0_1 = arith.constant 0 : index
    %3 = vector.load %arg1[%c0, %c0_1] : memref<8x1xf32, #tpu.memory_space<vmem>>, vector<8x1xf32>
    %c0_2 = arith.constant 0 : index
    %c0_3 = arith.constant 0 : index
    %4 = vector.load %arg2[%c0_2, %c0_3] : memref<8x4xf32, #tpu.memory_space<vmem>>, vector<8x4xf32>
    %5 = vector.extract_strided_slice %4 {offsets = [0, 0], sizes = [8, 1], strides = [1, 1]} : vector<8x4xf32> to vector<8x1xf32>
    %6 = arith.subf %3, %5 : vector<8x1xf32>
    %7 = arith.mulf %6, %6 : vector<8x1xf32>
    %8 = vector.shape_cast %7 : vector<8x1xf32> to vector<1x8x1xf32>
    %cst = arith.constant dense<0.000000e+00> : vector<1xf32>
    %9 = vector.multi_reduction <add>, %8, %cst [1, 2] : vector<1x8x1xf32> to vector<1xf32>
    %10 = vector.shape_cast %9 : vector<1xf32> to vector<1x1x1xf32>
    %11 = vector.extract %10[0, 0, 0] : f32 from vector<1x1x1xf32>
    %c0_4 = arith.constant 0 : index
    %c0_5 = arith.constant 0 : index
    %12 = vector.load %arg3[%c0_4, %c0_5] : memref<8x128xf32, #tpu.memory_space<vmem>>, vector<8x128xf32>
    %c0_6 = arith.constant 0 : index
    %c0_7 = arith.constant 0 : index
    %c0_8 = arith.constant 0 : index
    %13 = vector.load %arg4[%c0_6, %c0_7, %c0_8] : memref<8x5x128xf32, #tpu.memory_space<vmem>>, vector<8x5x128xf32>
    %c0_9 = arith.constant 0 : index
    %c0_10 = arith.constant 0 : index
    %14 = vector.load %arg5[%c0_9, %c0_10] : memref<8x5xf32, #tpu.memory_space<vmem>>, vector<8x5xf32>
    %15 = vector.shape_cast %12 : vector<8x128xf32> to vector<8x1x128xf32>
    "tpu.trace_start"() <{level = 10 : i32, message = "bqf,bkf->bqk"}> : () -> ()
    %cst_11 = arith.constant dense<0.000000e+00> : vector<8x1x5xf32>
    %16 = tpu.matmul %15, %13, %cst_11 {dimension_numbers = #tpu.dot_dimension_numbers<[2], [2], [1], [1], [0, 0, 0, 1, 1, 1], [0], [0]>} : vector<8x1x128xf32>, vector<8x5x128xf32>, vector<8x1x5xf32> -> vector<8x1x5xf32>
    "tpu.trace_stop"() : () -> ()
    %17 = vector.shape_cast %16 : vector<8x1x5xf32> to vector<8x5xf32>
    %18 = arith.mulf %12, %12 : vector<8x128xf32>
    %cst_12 = arith.constant dense<0.000000e+00> : vector<8xf32>
    %19 = vector.multi_reduction <add>, %18, %cst_12 [1] : vector<8x128xf32> to vector<8xf32>
    %20 = vector.shape_cast %19 : vector<8xf32> to vector<8x1xf32>
    %21 = math.sqrt %20 : vector<8x1xf32>
    %22 = arith.mulf %13, %13 : vector<8x5x128xf32>
    %cst_13 = arith.constant dense<0.000000e+00> : vector<8x5xf32>
    %23 = vector.multi_reduction <add>, %22, %cst_13 [2] : vector<8x5x128xf32> to vector<8x5xf32>
    %24 = math.sqrt %23 : vector<8x5xf32>
    %25 = vector.broadcast %21 : vector<8x1xf32> to vector<8x5xf32>
    %26 = arith.mulf %25, %24 : vector<8x5xf32>
    %cst_14 = arith.constant 9.99999993E-9 : f32
    %27 = vector.broadcast %cst_14 : f32 to vector<8x5xf32>
    %28 = arith.maximumf %26, %27 : vector<8x5xf32>
    %29 = arith.divf %17, %28 : vector<8x5xf32>
    %30 = arith.mulf %29, %14 : vector<8x5xf32>
    %cst_15 = arith.constant 5.000000e+00 : f32
    %31 = vector.broadcast %cst_15 : f32 to vector<8x5xf32>
    %32 = arith.mulf %30, %31 : vector<8x5xf32>
    %33 = math.exp %32 : vector<8x5xf32>
    %34 = tpu.iota {dimensions = array<i32: 1>} : vector<8x5xi32>
    %c2_i32 = arith.constant 2 : i32
    %35 = vector.broadcast %c2_i32 : i32 to vector<8x5xi32>
    %36 = arith.cmpi slt, %34, %35 : vector<8x5xi32>
    %cst_16 = arith.constant 0.000000e+00 : f32
    %37 = vector.broadcast %cst_16 : f32 to vector<8x5xf32>
    %38 = arith.select %36, %33, %37 : vector<8x5xi1>, vector<8x5xf32>
    %cst_17 = arith.constant dense<0.000000e+00> : vector<8xf32>
    %39 = vector.multi_reduction <add>, %38, %cst_17 [1] : vector<8x5xf32> to vector<8xf32>
    %40 = vector.shape_cast %39 : vector<8xf32> to vector<8x1xf32>
    %cst_18 = arith.constant dense<0.000000e+00> : vector<8xf32>
    %41 = vector.multi_reduction <add>, %33, %cst_18 [1] : vector<8x5xf32> to vector<8xf32>
    %42 = vector.shape_cast %41 : vector<8xf32> to vector<8x1xf32>
    %c0_19 = arith.constant 0 : index
    %c0_20 = arith.constant 0 : index
    %43 = vector.load %arg7[%c0_19, %c0_20] : memref<1x1xf32, #tpu.memory_space<vmem>>, vector<1x1xf32>
    %44 = vector.broadcast %11 : f32 to vector<1x1xf32>
    %45 = arith.addf %43, %44 : vector<1x1xf32>
    %c0_21 = arith.constant 0 : index
    %c0_22 = arith.constant 0 : index
    %46 = vector.load %arg7[%c0_21, %c0_22] : memref<1x1xf32, #tpu.memory_space<vmem>>, vector<1x1xf32>
    tpu.vector_store %arg7[%c0_21, %c0_22], %45 {strides = array<i32>} : memref<1x1xf32, #tpu.memory_space<vmem>>, vector<1x1xf32>,
    %c0_23 = arith.constant 0 : index
    %c0_24 = arith.constant 0 : index
    %47 = vector.load %arg8[%c0_23, %c0_24] : memref<1x1xf32, #tpu.memory_space<vmem>>, vector<1x1xf32>
    %48 = arith.divf %40, %42 : vector<8x1xf32>
    %49 = vector.shape_cast %48 : vector<8x1xf32> to vector<1x8x1xf32>
    %cst_25 = arith.constant dense<0.000000e+00> : vector<1xf32>
    %50 = vector.multi_reduction <add>, %49, %cst_25 [1, 2] : vector<1x8x1xf32> to vector<1xf32>
    %51 = vector.shape_cast %50 : vector<1xf32> to vector<1x1x1xf32>
    %52 = vector.extract %51[0, 0, 0] : f32 from vector<1x1x1xf32>
    %53 = vector.broadcast %52 : f32 to vector<1x1xf32>
    %54 = arith.addf %47, %53 : vector<1x1xf32>
    %c0_26 = arith.constant 0 : index
    %c0_27 = arith.constant 0 : index
    %55 = vector.load %arg8[%c0_26, %c0_27] : memref<1x1xf32, #tpu.memory_space<vmem>>, vector<1x1xf32>
    tpu.vector_store %arg8[%c0_26, %c0_27], %54 {strides = array<i32>} : memref<1x1xf32, #tpu.memory_space<vmem>>, vector<1x1xf32>,
    %c1_i32 = arith.constant 1 : i32
    %56 = arith.cmpi eq, %arg0, %c1_i32 : i32
    %57 = arith.extui %56 : i1 to i32
    %c0_i32_28 = arith.constant 0 : i32
    %58 = arith.cmpi ne, %57, %c0_i32_28 : i32
    scf.if %58 {
      %c0_29 = arith.constant 0 : index
      %c0_30 = arith.constant 0 : index
      %59 = vector.load %arg7[%c0_29, %c0_30] : memref<1x1xf32, #tpu.memory_space<vmem>>, vector<1x1xf32>
      %cst_31 = arith.constant 6.250000e-02 : f32
      %60 = vector.broadcast %cst_31 : f32 to vector<1x1xf32>
      %61 = arith.mulf %59, %60 : vector<1x1xf32>
      %c0_32 = arith.constant 0 : index
      %c0_33 = arith.constant 0 : index
      %62 = vector.load %arg8[%c0_32, %c0_33] : memref<1x1xf32, #tpu.memory_space<vmem>>, vector<1x1xf32>
      %cst_34 = arith.constant 6.250000e-02 : f32
      %63 = vector.broadcast %cst_34 : f32 to vector<1x1xf32>
      %64 = arith.mulf %62, %63 : vector<1x1xf32>
      %65 = math.log %64 : vector<1x1xf32>
      %cst_35 = arith.constant 0.000000e+00 : f32
      %66 = vector.broadcast %cst_35 : f32 to vector<1x1xf32>
      %67 = arith.subf %66, %65 : vector<1x1xf32>
      %68 = arith.addf %61, %67 : vector<1x1xf32>
      %c0_36 = arith.constant 0 : index
      %c0_37 = arith.constant 0 : index
      %69 = vector.load %arg6[%c0_36, %c0_37] : memref<1x1xf32, #tpu.memory_space<vmem>>, vector<1x1xf32>
      tpu.vector_store %arg6[%c0_36, %c0_37], %68 {strides = array<i32>} : memref<1x1xf32, #tpu.memory_space<vmem>>, vector<1x1xf32>,
    } else {
    }
    return
  }
  func.func @transform_0(%arg0: i32) -> (i32, i32) {
    %c0_i32 = arith.constant 0 : i32
    %c0_i32_0 = arith.constant 0 : i32
    return %arg0, %c0_i32 : i32, i32
  }
  func.func @transform_1(%arg0: i32) -> (i32, i32) {
    %c0_i32 = arith.constant 0 : i32
    %c0_i32_0 = arith.constant 0 : i32
    return %arg0, %c0_i32 : i32, i32
  }
  func.func @transform_2(%arg0: i32) -> (i32, i32) {
    %c0_i32 = arith.constant 0 : i32
    %c0_i32_0 = arith.constant 0 : i32
    return %arg0, %c0_i32 : i32, i32
  }
  func.func @transform_3(%arg0: i32) -> (i32, i32, i32) {
    %c0_i32 = arith.constant 0 : i32
    %c0_i32_0 = arith.constant 0 : i32
    %c0_i32_1 = arith.constant 0 : i32
    return %arg0, %c0_i32, %c0_i32_0 : i32, i32, i32
  }
  func.func @transform_4(%arg0: i32) -> (i32, i32) {
    %c0_i32 = arith.constant 0 : i32
    %c0_i32_0 = arith.constant 0 : i32
    return %arg0, %c0_i32 : i32, i32
  }
  func.func @transform_5(%arg0: i32) -> (i32, i32) {
    %c0_i32 = arith.constant 0 : i32
    %c0_i32_0 = arith.constant 0 : i32
    %c0_i32_1 = arith.constant 0 : i32
    return %c0_i32, %c0_i32_0 : i32, i32
  }
}

</mosaic_0001>

<bundles_post_ra>
// kernel: tpu_custom_call.1
= control target key start
LH: loop header
LB: loop body
LE: loop exit
PB: predicated region body
PF: predicated region fallthrough
CT: control target
= control target key end

     0   :  { %10 = vsyncpa [#allocation5], 0  ;;  %s1552_s18 = smov 0   ;;  %s1741_s0 = inlined_call_operand.vmem [shape: f32[16,1], index: 0, kind: input, shape index: {}]   ;;  %s1742_s1 = inlined_call_operand.vmem [shape: f32[16,4], index: 1, kind: input, shape index: {}]   ;;  %s1743_s2 = inlined_call_operand.vmem [shape: f32[16,128], index: 2, kind: input, shape index: {}]   ;;  %s1744_s3 = inlined_call_operand.vmem [shape: f32[16,5,128], index: 3, kind: input, shape index: {}]   ;;  %s1745_s4 = inlined_call_operand.vmem [shape: f32[16,5], index: 4, kind: input, shape index: {}]   ;;  %s1746_s5 = inlined_call_operand.hbm [shape: f32[1,1], index: 5, kind: output, shape index: {}]  }
   0x1 LB: > { %s1558_s19 = sadd.s32 4294967295, %s1515_s18   ;;  %p1332_p0 = scmp.ge.s32.totalorder %s1515_s18, 1  ;;  %s1515_s18 = sphi %s1552_s18, %s16_s18  }
   0x2   : > { %p220_p1 = scmp.lt.s32.totalorder %s1515_s18, 3 }
   0x4   : > { %p221_p2 = pnand %p1332_p0, %p220_p1 }
   0x5   : > { %p259_p3 = scmp.lt.s32.totalorder (!%p221_p2), %s1558_s19, 1  ;;  %s1336_s20 = sshll.u32 (!%p221_p2), %s1558_s19, 3 }
   0x6   : > { %224 = sbr.rel (%p221_p2) target bundleno = 698 (0x2ba), region = 40  ;;  %p272_p4 = scmp.lt.s32.totalorder (!%p221_p2), %s1336_s20, 15 }
   0x7   : > { %p1339_p5 = scmp.ne.s32.totalorder (!%p221_p2), %s1558_s19, 0 }
   0xd   : > { %s260_s21 = scalar_select %p259_p3, %s1558_s19, 1 }
   0xe   : > { %s1748_s20 = smov (!%p272_p4, %s1336_s20), 15  ;;  %284 = sbr.rel (%p1339_p5) target bundleno = 21 (0x15), region = 44 }
   0xf   : > { %s1565_s22 = sshll.u32 %s260_s21, 3  ;;  %s1337_s7 = sshll.u32 %s1748_s20, 3  ;;  %vm285_vm0 = vcmask (!%p1339_p5), 0   ;;  %v1517_v0 = vmov (!%p1339_p5), 0.0  }
  0x10   : > { %s262_s25 = scalar_lea.vmem %s1741_s0, %s1565_s22  ;;  %s266_s28 = scalar_lea.vmem %s1742_s1, %s1565_s22  ;;  %286 = vst.msk [vmem:[#allocation2] sm:$0x1] (!%p1339_p5), %vm285_vm0, %v1517_v0  ;;  %287 = vst.msk [vmem:[#allocation3] sm:$0x1] (!%p1339_p5), %vm285_vm0, %v1517_v0 }
  0x11   : > { %s270_s6 = scalar_lea.vmem %s1743_s2, %s1565_s22  ;;  %s1582_s10 = scalar_lea.vmem %s1744_s3, %s1337_s7 }
  0x12   : > { %s280_s13 = scalar_lea.vmem %s1745_s4, %s1565_s22 }
  0x15 PF: > { %v304_v1 = vld [vmem:[%s1582_s10] sm:$0x1f]  ;;  %v305_v2 = vld [vmem:[%s1582_s10 + $0x8] sm:$0x1f]  ;;  %v318_v3 = vlaneseq  ;;  %v1518_v4 = vmov 0.0   ;;  %vm949_vm1 = vcmask 1044480  }
  0x16   : > { %1361 = vmatprep.subr.mxu0 %v1518_v4  ;;  %v941_v5 = vmul.f32 %v304_v1, %v304_v1  ;;  %1366 = vmatprep.subr.mxu1 %v1518_v4  ;;  %v942_v6 = vmul.f32 %v305_v2, %v305_v2  ;;  %v1519_v7 = vmov 1966171168   ;;  %v306_v11 = vld [vmem:[%s1582_s10 + $0x10] sm:$0x1f]  ;;  %v307_v12 = vld [vmem:[%s1582_s10 + $0x18] sm:$0x1f] }
  0x17   : > { %1362 = vmatpush3.xpose.msra.mxu0 %v304_v1  ;;  %1367 = vmatpush3.xpose.msra.mxu1 %v305_v2  ;;  %v316_v8 = vunpack.c.l.s4 %v1519_v7  ;;  %v319_v9 = vshrl.u32 %v318_v3, 7  ;;  %v1593_v10 = vand.u32 127, %v318_v3  ;;  %vm1520_vm2 = vmmov 0   ;;  %v303_v18 = vld [vmem:[%s270_s6] sm:$0xff]  ;;  %v309_v34 = vld [vmem:[%s1582_s10 + $0x28] sm:$0x1f] }
  0x18   : > { %1363 = vmatprep.mubr.msk.f32.mxu0 %vm1520_vm2, %v1518_v4  ;;  %1371 = vmatprep.subr.mxu0 %v1518_v4  ;;  %v950_v13 = vsel %vm949_vm1, %v941_v5, 0.0  ;;  %v943_v14 = vmul.f32 %v306_v11, %v306_v11  ;;  %v944_v15 = vmul.f32 %v307_v12, %v307_v12  ;;  %v314_v20 = vcombine.high %v303_v18, %v303_v18  ;;  %v308_v31 = vld [vmem:[%s1582_s10 + $0x20] sm:$0x1f]  ;;  %v310_v37 = vld [vmem:[%s1582_s10 + $0x30] sm:$0x1f]  ;;  %p1340_p6 = scmp.ne.s32.totalorder %s1558_s19, 1 }
  0x19   : > { %v317_v16 = vunpack.c.0.s8 %v316_v8  ;;  %v1602_v17 = vsub.s32 %v1593_v10, %v319_v9  ;;  %1368 = vmatprep.mubr.msk.f32.mxu1 %vm1520_vm2, %v1518_v4  ;;  %1376 = vmatprep.subr.mxu1 %v1518_v4  ;;  %v953_v22 = vsel %vm949_vm1, %v942_v6, 0.0  ;;  %v945_v33 = vmul.f32 %v308_v31, %v308_v31  ;;  %v311_v41 = vld [vmem:[%s1582_s10 + $0x38] sm:$0x1f] }
  0x1a   : > { %951 = vadd.xlane.f32.xlu0 %v950_v13  ;;  %v956_v19 = vsel %vm949_vm1, %v943_v14, 0.0  ;;  %v959_v23 = vsel %vm949_vm1, %v944_v15, 0.0  ;;  %v946_v36 = vmul.f32 %v309_v34, %v309_v34  ;;  %v947_v40 = vmul.f32 %v310_v37, %v310_v37 }
  0x1b   : > { %v320_v21 = vsub.s32 %v317_v16, %v319_v9  ;;  %957 = vadd.xlane.f32.xlu1 %v956_v19  ;;  %v962_v39 = vsel %vm949_vm1, %v945_v33, 0.0  ;;  %v948_v44 = vmul.f32 %v311_v41, %v311_v41  ;;  %v931_v48 = vmul.f32 %v303_v18, %v303_v18 }
  0x1c   : > { %v965_v43 = vsel %vm949_vm1, %v946_v36, 0.0  ;;  %v968_v46 = vsel %vm949_vm1, %v947_v40, 0.0  ;;  %vm1072_vm12 = vcmask 1041409   ;;  %vm1074_vm15 = vcmask 1042434  }
  0x1d   : > { %v321_v24 = vrot.slane %v303_v18, %v320_v21  ;;  %v328_v27 = vrot.slane %v314_v20, %v320_v21  ;;  %v971_v47 = vsel %vm949_vm1, %v948_v44, 0.0 }
  0x1e   : > { %954 = vadd.xlane.f32.xlu0 %v953_v22 }
  0x1f   : > { %v337_v25 = vrot.slane %v321_v24, %v320_v21  ;;  %v329_v26 = vcombine.high %v321_v24, %v321_v24  ;;  %960 = vadd.xlane.f32.xlu1 %v959_v23  ;;  %v330_v32 = vcombine.high %v328_v27, %v328_v27  ;;  %v344_v35 = vrot.slane %v328_v27, %v320_v21 }
  0x21   : > { %v359_v28 = vcombine.high %v337_v25, %v337_v25  ;;  %1364 = vmatmul.mubr.f32.vlgmr.msra.gmra.mrb[0].mxu0 %v337_v25  ;;  %v351_v29 = vrot.slane %v329_v26, %v320_v21  ;;  %v358_v38 = vrot.slane %v330_v32, %v320_v21  ;;  %v360_v42 = vcombine.high %v344_v35, %v344_v35 }
  0x22   : > { %1372 = vmatpush3.xpose.msra.mxu0 %v306_v11  ;;  %1373 = vmatprep.mubr.msk.f32.mxu0 %vm1520_vm2, %v1518_v4 }
  0x23   : > { %v361_v30 = vcombine.high %v351_v29, %v351_v29  ;;  %1369 = vmatmul.mubr.f32.vlgmr.msra.gmra.mrb[0].mxu1 %v351_v29  ;;  %1381 = vmatprep.subr.mxu0 %v1518_v4  ;;  %v362_v45 = vcombine.high %v358_v38, %v358_v38 }
  0x24   : > { %1377 = vmatpush3.xpose.msra.mxu1 %v307_v12  ;;  %1378 = vmatprep.mubr.msk.f32.mxu1 %vm1520_vm2, %v1518_v4 }
  0x25   : > { %1374 = vmatmul.mubr.f32.vlgmr.msra.gmra.mrb[2].mxu0 %v359_v28  ;;  %1386 = vmatprep.subr.mxu1 %v1518_v4 }
  0x26   : > { %1382 = vmatpush3.xpose.msra.mxu0 %v308_v31  ;;  %1383 = vmatprep.mubr.msk.f32.mxu0 %vm1520_vm2, %v1518_v4 }
  0x27   : > { %1379 = vmatmul.mubr.f32.vlgmr.msra.gmra.mrb[2].mxu1 %v361_v30  ;;  %1391 = vmatprep.subr.mxu0 %v1518_v4 }
  0x28   : > { %1387 = vmatpush3.xpose.msra.mxu1 %v309_v34  ;;  %1388 = vmatprep.mubr.msk.f32.mxu1 %vm1520_vm2, %v1518_v4 }
  0x29   : > { %1384 = vmatmul.mubr.f32.vlgmr.msra.gmra.mrb[4].mxu0 %v344_v35  ;;  %1396 = vmatprep.subr.mxu1 %v1518_v4 }
  0x2a   : > { %1392 = vmatpush3.xpose.msra.mxu0 %v310_v37  ;;  %1393 = vmatprep.mubr.msk.f32.mxu0 %vm1520_vm2, %v1518_v4 }
  0x2b   : > { %1389 = vmatmul.mubr.f32.vlgmr.msra.gmra.mrb[4].mxu1 %v358_v38  ;;  %963 = vadd.xlane.f32.xlu0 %v962_v39 }
  0x2c   : > { %1397 = vmatpush3.xpose.msra.mxu1 %v311_v41  ;;  %1398 = vmatprep.mubr.msk.f32.mxu1 %vm1520_vm2, %v1518_v4  ;;  %vm1076_vm2 = vcmask 1043459  }
  0x2d   : > { %1394 = vmatmul.mubr.f32.vlgmr.msra.gmra.mrb[6].mxu0 %v360_v42  ;;  %966 = vadd.xlane.f32.xlu1 %v965_v43 }
  0x2f   : > { %1399 = vmatmul.mubr.f32.vlgmr.msra.gmra.mrb[6].mxu1 %v362_v45  ;;  %969 = vadd.xlane.f32.xlu0 %v968_v46 }
  0x31   : > { %972 = vadd.xlane.f32.xlu1 %v971_v47 }
  0x33   : > { %932 = vadd.xlane.f32.xlu0 %v931_v48 }
  0xa7   : > { %v952_v49 = vpop.xlane.xlu0 %951 }
  0xa8   : > { %v958_v50 = vpop.xlane.xlu1 %957  ;;  %1425 = vrsqrt.f32 %v952_v49  ;;  %vm976_vm3 = vcmp.eq.f32.partialorder %v952_v49, inf  ;;  %vm978_vm5 = vcmp.eq.f32.partialorder %v952_v49, 0.0  ;;  %v979_v63 = vand.u32 2147483648, %v952_v49 }
  0xa9   : > { %vm990_vm6 = vcmp.eq.f32.partialorder %v958_v50, inf  ;;  %v993_v6 = vand.u32 2147483648, %v958_v50  ;;  %vm992_vm9 = vcmp.eq.f32.partialorder %v958_v50, 0.0 }
  0xab   : > { %v955_v51 = vpop.xlane.xlu0 %954 }
  0xac   : > { %1427 = vrsqrt.f32 %v955_v51  ;;  %v961_v52 = vpop.xlane.xlu1 %960  ;;  %vm983_vm4 = vcmp.eq.f32.partialorder %v955_v51, inf  ;;  %v986_v1 = vand.u32 2147483648, %v955_v51  ;;  %vm985_vm7 = vcmp.eq.f32.partialorder %v955_v51, 0.0 }
  0xad   : > { %1429 = vrsqrt.f32 %v958_v50  ;;  %vm997_vm8 = vcmp.eq.f32.partialorder %v961_v52, inf  ;;  %v1000_v11 = vand.u32 2147483648, %v961_v52  ;;  %vm999_vm10 = vcmp.eq.f32.partialorder %v961_v52, 0.0 }
  0xae   : > { %1431 = vrsqrt.f32 %v961_v52 }
  0xb2   : > { %v1426_v54 = vpop.eup %1425 }
  0xb3   : > { %v975_v59 = vmul.f32 %v1426_v54, %v952_v49 }
  0xb5   : > { %v977_v2 = vsel %vm976_vm3, %v952_v49, %v975_v59 }
  0xb6   : > { %v1428_v55 = vpop.eup %1427  ;;  %v980_v7 = vsel %vm978_vm5, %v979_v63, %v977_v2  ;;  %vm1078_vm5 = vcmask 1044484  }
  0xb7   : > { %v1430_v58 = vpop.eup %1429  ;;  %v982_v60 = vmul.f32 %v1428_v55, %v955_v51  ;;  %v1043_v16 = vrot.slane %v980_v7, %v1602_v17 }
  0xb8   : > { %v964_v53 = vpop.xlane.xlu0 %963  ;;  %v1432_v61 = vpop.eup %1431  ;;  %v989_v0 = vmul.f32 %v1430_v58, %v958_v50 }
  0xb9   : > { %1433 = vrsqrt.f32 %v964_v53  ;;  %v984_v3 = vsel %vm983_vm4, %v955_v51, %v982_v60  ;;  %v996_v4 = vmul.f32 %v1432_v61, %v961_v52  ;;  %vm1004_vm11 = vcmp.eq.f32.partialorder %v964_v53, inf }
  0xba   : > { %v1639_v56 = vpop.xlane.xlu1 %966  ;;  %v991_v8 = vsel %vm990_vm6, %v958_v50, %v989_v0  ;;  %v987_v9 = vsel %vm985_vm7, %v986_v1, %v984_v3  ;;  %v1007_v22 = vand.u32 2147483648, %v964_v53  ;;  %vm1006_vm13 = vcmp.eq.f32.partialorder %v964_v53, 0.0 }
  0xbb   : > { %1435 = vrsqrt.f32 %v1639_v56  ;;  %v998_v13 = vsel %vm997_vm8, %v961_v52, %v996_v4  ;;  %v994_v18 = vsel %vm992_vm9, %v993_v6, %v991_v8  ;;  %v1047_v19 = vrot.slane %v987_v9, %v1602_v17 }
  0xbc   : > { %v1642_v57 = vpop.xlane.xlu0 %969  ;;  %v1001_v21 = vsel %vm999_vm10, %v1000_v11, %v998_v13  ;;  %v1051_v24 = vrot.slane %v994_v18, %v1602_v17  ;;  %vm1011_vm14 = vcmp.eq.f32.partialorder %v1639_v56, inf  ;;  %v1014_v29 = vand.u32 2147483648, %v1639_v56 }
  0xbd   : > { %1437 = vrsqrt.f32 %v1642_v57  ;;  %v1073_v26 = vsel %vm1072_vm12, %v1047_v19, %v1043_v16  ;;  %v1055_v28 = vrot.slane %v1001_v21, %v1602_v17  ;;  %vm1013_vm0 = vcmp.eq.f32.partialorder %v1639_v56, 0.0 }
  0xbe   : > { %v1645_v62 = vpop.xlane.xlu1 %972  ;;  %vm1018_vm1 = vcmp.eq.f32.partialorder %v1642_v57, inf  ;;  %v1075_v33 = vsel %vm1074_vm15, %v1051_v24, %v1073_v26  ;;  %vm1020_vm3 = vcmp.eq.f32.partialorder %v1642_v57, 0.0  ;;  %v1021_v34 = vand.u32 2147483648, %v1642_v57 }
  0xbf   : > { %1439 = vrsqrt.f32 %v1645_v62  ;;  %vm1025_vm4 = vcmp.eq.f32.partialorder %v1645_v62, inf  ;;  %v1077_v39 = vsel %vm1076_vm2, %v1055_v28, %v1075_v33  ;;  %v1028_v40 = vand.u32 2147483648, %v1645_v62 }
  0xc0   : > { %v933_v15 = vpop.xlane.xlu0 %932  ;;  %vm1027_vm6 = vcmp.eq.f32.partialorder %v1645_v62, 0.0  ;;  %vm1080_vm7 = vcmask 1045509   ;;  %vm1082_vm9 = vcmask 1046534  }
  0xc1   : > { %1441 = vrsqrt.f32 %v933_v15  ;;  %vm936_vm8 = vcmp.eq.f32.partialorder %v933_v15, inf  ;;  %v939_v51 = vand.u32 2147483648, %v933_v15  ;;  %vm938_vm10 = vcmp.eq.f32.partialorder %v933_v15, 0.0 }
  0xc3   : > { %v1434_v5 = vpop.eup %1433 }
  0xc4   : > { %v1003_v14 = vmul.f32 %v1434_v5, %v964_v53 }
  0xc5   : > { %v1436_v12 = vpop.eup %1435 }
  0xc6   : > { %v1010_v23 = vmul.f32 %v1436_v12, %v1639_v56  ;;  %v1005_v25 = vsel %vm1004_vm11, %v964_v53, %v1003_v14  ;;  %vm1084_vm11 = vcmask 1047559  }
  0xc7   : > { %v1438_v20 = vpop.eup %1437  ;;  %v1008_v31 = vsel %vm1006_vm13, %v1007_v22, %v1005_v25  ;;  %vm1169_vm13 = vcmp.lt.s32.totalorder %v1593_v10, 2 }
  0xc8   : > { %v1017_v30 = vmul.f32 %v1438_v20, %v1642_v57  ;;  %v1012_v32 = vsel %vm1011_vm14, %v1639_v56, %v1010_v23  ;;  %v1059_v36 = vrot.slane %v1008_v31, %v1602_v17  ;;  %vm292_vm14 = vcmask 7168  }
  0xc9   : > { %v1440_v27 = vpop.eup %1439  ;;  %v1015_v37 = vsel %vm1013_vm0, %v1014_v29, %v1012_v32 }
  0xca   : > { %v1024_v35 = vmul.f32 %v1440_v27, %v1645_v62  ;;  %v1019_v38 = vsel %vm1018_vm1, %v1642_v57, %v1017_v30  ;;  %v1063_v42 = vrot.slane %v1015_v37, %v1602_v17  ;;  %v1079_v45 = vsel %vm1078_vm5, %v1059_v36, %v1077_v39 }
  0xcb   : > { %v1442_v41 = vpop.eup %1441  ;;  %v1022_v43 = vsel %vm1020_vm3, %v1021_v34, %v1019_v38 }
  0xcc   : > { %v1026_v44 = vsel %vm1025_vm4, %v1645_v62, %v1024_v35  ;;  %v1067_v46 = vrot.slane %v1022_v43, %v1602_v17  ;;  %v935_v48 = vmul.f32 %v1442_v41, %v933_v15  ;;  %v1081_v49 = vsel %vm1080_vm7, %v1063_v42, %v1079_v45  ;;  %v1683_v62 = vld [vmem:[%s280_s13] sm:$0xff] }
  0xcd   : > { %v1029_v47 = vsel %vm1027_vm6, %v1028_v40, %v1026_v44  ;;  %v1122_v5 = vrot.slane %v1683_v62, 1  ;;  %v1123_v12 = vrot.slane %v1683_v62, 2  ;;  %v1124_v20 = vrot.slane %v1683_v62, 3 }
  0xce   : > { %v1071_v50 = vrot.slane %v1029_v47, %v1602_v17  ;;  %v937_v52 = vsel %vm936_vm8, %v933_v15, %v935_v48  ;;  %v1083_v53 = vsel %vm1082_vm9, %v1067_v46, %v1081_v49  ;;  %v1125_v29 = vrot.slane %v1683_v62, 4 }
  0xcf   : > { %v940_v54 = vsel %vm938_vm10, %v939_v51, %v937_v52  ;;  %v1126_v35 = vrot.slane %v1683_v62, 5  ;;  %v1127_v39 = vrot.slane %v1683_v62, 6  ;;  %v1128_v47 = vrot.slane %v1683_v62, 7 }
  0xd0   : > { %v1085_v55 = vsel %vm1084_vm11, %v1071_v50, %v1083_v53 }
  0xd1   : > { %v1087_v56 = vmul.f32 %v1085_v55, %v940_v54 }
  0xd3   : > { %v1088_v57 = vmax.f32 %v1087_v56, 1e-08 }
  0xd5   : > { %v1090_v58 = vrot.slane %v1088_v57, 1  ;;  %1443 = vrcp.f32 %v1088_v57  ;;  %v1091_v59 = vrot.slane %v1088_v57, 2  ;;  %v1092_v60 = vrot.slane %v1088_v57, 3 }
  0xd6   : > { %v1093_v61 = vrot.slane %v1088_v57, 4  ;;  %v1094_v17 = vrot.slane %v1088_v57, 5  ;;  %v1095_v63 = vrot.slane %v1088_v57, 6  ;;  %v1096_v2 = vrot.slane %v1088_v57, 7 }
  0xd7   : > { %1445 = vrcp.f32 %v1090_v58 }
  0xd8   : > { %1447 = vrcp.f32 %v1091_v59 }
  0xd9   : > { %1449 = vrcp.f32 %v1092_v60 }
  0xda   : > { %1451 = vrcp.f32 %v1093_v61 }
  0xdb   : > { %1453 = vrcp.f32 %v1094_v17 }
  0xdc   : > { %1455 = vrcp.f32 %v1095_v63 }
  0xdd   : > { %1457 = vrcp.f32 %v1096_v2 }
  0xdf   : > { %v1444_v0 = vpop.eup %1443 }
  0xe1   : > { %v1446_v6 = vpop.eup %1445 }
  0xe2   : > { %v1448_v13 = vpop.eup %1447 }
  0xe3   : > { %v1450_v21 = vpop.eup %1449 }
  0xe4   : > { %v1452_v30 = vpop.eup %1451 }
  0xe5   : > { %v1454_v36 = vpop.eup %1453 }
  0xe6   : > { %v1456_v44 = vpop.eup %1455 }
  0xe7   : > { %v1458_v52 = vpop.eup %1457 }
  0xf4   : > { %v437_v1 = vpop.f32.mrb[0].mxu0 }
  0xf5   : > { %v1106_v3 = vmul.f32 %v1444_v0, %v437_v1  ;;  %v1365_v4 = vpop.f32.mrb[1].mxu0 }
  0xf6   : > { %v507_v7 = vpop.f32.mrb[0].mxu1 }
  0xf7   : > { %v1137_v8 = vmul.f32 %v1106_v3, %v1683_v62  ;;  %v1108_v9 = vmul.f32 %v1446_v6, %v507_v7  ;;  %v1370_v11 = vpop.f32.mrb[1].mxu1 }
  0xf8   : > { %v577_v14 = vpop.f32.mrb[2].mxu0 }
  0xf9   : > { %v1145_v15 = vmul.f32 5.0, %v1137_v8  ;;  %v1138_v16 = vmul.f32 %v1122_v5, %v1108_v9  ;;  %v1110_v18 = vmul.f32 %v1448_v13, %v577_v14  ;;  %v1375_v19 = vpop.f32.mrb[3].mxu0 }
  0xfa   : > { %v647_v22 = vpop.f32.mrb[2].mxu1 }
  0xfb   : > { %v1146_v23 = vmul.f32 5.0, %v1138_v16  ;;  %v1139_v24 = vmul.f32 %v1123_v12, %v1110_v18  ;;  %v1112_v25 = vmul.f32 %v1450_v21, %v647_v22  ;;  %v1380_v26 = vpop.f32.mrb[3].mxu1  ;;  %v1153_v27 = vmul.f32 1.442695, %v1145_v15 }
  0xfc   : > { %v717_v28 = vpop.f32.mrb[4].mxu0 }
  0xfd   : > { %v1155_v31 = vmul.f32 1.442695, %v1146_v23  ;;  %v1147_v32 = vmul.f32 5.0, %v1139_v24  ;;  %v1140_v33 = vmul.f32 %v1124_v20, %v1112_v25  ;;  %v1385_v34 = vpop.f32.mrb[5].mxu0  ;;  %v1114_v37 = vmul.f32 %v1452_v30, %v717_v28  ;;  %v288_v28 = vld [vmem:[%s262_s25] sm:$0xff] }
  0xfe   : > { %v787_v38 = vpop.f32.mrb[4].mxu1 }
  0xff   : > { %1459 = vpow2.f32 %v1155_v31  ;;  %v1157_v40 = vmul.f32 1.442695, %v1147_v32  ;;  %v1148_v41 = vmul.f32 5.0, %v1140_v33  ;;  %v1116_v42 = vmul.f32 %v1454_v36, %v787_v38  ;;  %v1390_v43 = vpop.f32.mrb[5].mxu1 }
 0x100   : > { %1461 = vpow2.f32 %v1153_v27  ;;  %v1141_v45 = vmul.f32 %v1125_v29, %v1114_v37  ;;  %v857_v46 = vpop.f32.mrb[6].mxu0  ;;  %v289_v29 = vld [vmem:[%s266_s28] sm:$0xff] }
 0x101   : > { %1463 = vpow2.f32 %v1157_v40  ;;  %v1159_v48 = vmul.f32 1.442695, %v1148_v41  ;;  %v1142_v49 = vmul.f32 %v1126_v35, %v1116_v42  ;;  %v1118_v50 = vmul.f32 %v1456_v44, %v857_v46  ;;  %v1395_v51 = vpop.f32.mrb[7].mxu0  ;;  %v1201_v44 = vld [vmem:[#allocation2] sm:$0x1] }
 0x102   : > { %v1149_v53 = vmul.f32 5.0, %v1141_v45  ;;  %v927_v54 = vpop.f32.mrb[6].mxu1  ;;  %v290_v30 = vsub.f32 %v288_v28, %v289_v29 }
 0x103   : > { %1465 = vpow2.f32 %v1159_v48  ;;  %v1150_v55 = vmul.f32 5.0, %v1142_v49  ;;  %v1143_v56 = vmul.f32 %v1127_v39, %v1118_v50  ;;  %v1120_v57 = vmul.f32 %v1458_v52, %v927_v54  ;;  %v1400_v58 = vpop.f32.mrb[7].mxu1  ;;  %v1206_v54 = vld [vmem:[#allocation3] sm:$0x1] }
 0x104   : > { %v1161_v59 = vmul.f32 1.442695, %v1149_v53  ;;  %v291_v31 = vmul.f32 %v290_v30, %v290_v30 }
 0x105   : > { %v1163_v60 = vmul.f32 1.442695, %v1150_v55  ;;  %v1151_v61 = vmul.f32 5.0, %v1143_v56  ;;  %v1144_v17 = vmul.f32 %v1128_v47, %v1120_v57 }
 0x106   : > { %1467 = vpow2.f32 %v1161_v59  ;;  %v293_v10 = vsel %vm292_vm14, %v291_v31, 0.0 }
 0x107   : > { %1469 = vpow2.f32 %v1163_v60  ;;  %v1165_v62 = vmul.f32 1.442695, %v1151_v61  ;;  %v1152_v63 = vmul.f32 5.0, %v1144_v17 }
 0x109   : > { %v1460_v0 = vpop.eup %1459  ;;  %1471 = vpow2.f32 %v1165_v62  ;;  %v1167_v1 = vmul.f32 1.442695, %v1152_v63 }
 0x10a   : > { %v1462_v2 = vpop.eup %1461  ;;  %v1178_v3 = vrot.slane %v1460_v0, 7 }
 0x10b   : > { %v1464_v4 = vpop.eup %1463  ;;  %1473 = vpow2.f32 %v1167_v1 }
 0x10c   : > { %v1179_v5 = vsel %vm1072_vm12, %v1178_v3, %v1462_v2  ;;  %v1180_v6 = vrot.slane %v1464_v4, 6  ;;  %vm1194_vm12 = vcmask 39936  }
 0x10d   : > { %v1466_v7 = vpop.eup %1465 }
 0x10e   : > { %v1181_v8 = vsel %vm1074_vm15, %v1180_v6, %v1179_v5  ;;  %v1182_v9 = vrot.slane %v1466_v7, 5  ;;  %vm1204_vm15 = vcmask 0  }
 0x110   : > { %v1468_v11 = vpop.eup %1467  ;;  %v1183_v12 = vsel %vm1076_vm2, %v1182_v9, %v1181_v8 }
 0x111   : > { %v1470_v13 = vpop.eup %1469  ;;  %v1184_v14 = vrot.slane %v1468_v11, 4 }
 0x112   : > { %v1186_v15 = vrot.slane %v1470_v13, 3 }
 0x113   : > { %v1472_v16 = vpop.eup %1471  ;;  %v1185_v18 = vsel %vm1078_vm5, %v1184_v14, %v1183_v12 }
 0x114   : > { %v1188_v19 = vrot.slane %v1472_v16, 2  ;;  %v1187_v20 = vsel %vm1080_vm7, %v1186_v15, %v1185_v18 }
 0x115   : > { %v1474_v21 = vpop.eup %1473 }
 0x116   : > { %v1189_v22 = vsel %vm1082_vm9, %v1188_v19, %v1187_v20  ;;  %v1190_v23 = vrot.slane %v1474_v21, 1 }
 0x118   : > { %v1191_v24 = vsel %vm1084_vm11, %v1190_v23, %v1189_v22 }
 0x119   : > { %v1198_v25 = vsel %vm1194_vm12, %v1191_v24, 0.0  ;;  %v1193_v26 = vsel %vm1169_vm13, %v1191_v24, 0.0 }
 0x11a   : > { %1199 = vadd.xlane.f32.xlu1 %v1198_v25  ;;  %v1195_v27 = vsel %vm1194_vm12, %v1193_v26, 0.0 }
 0x11b   : > { %1196 = vadd.xlane.f32.xlu0 %v1195_v27 }
 0x11e   : > { %294 = vadd.xlane.f32.xlu1 %v293_v10 }
 0x1a7   : > { %v1200_v32 = vpop.xlane.xlu1 %1199 }
 0x1a8   : > { %1475 = vrcp.f32 %v1200_v32  ;;  %v1197_v34 = vpop.xlane.xlu0 %1196 }
 0x1ab   : > { %v295_v37 = vpop.xlane.xlu1 %294 }
 0x1ac   : > { %v296_v38 = vrot.slane %v295_v37, 4 }
 0x1ae   : > { %v297_v39 = vadd.f32 %v296_v38, %v295_v37 }
 0x1b0   : > { %v298_v40 = vrot.slane %v297_v39, 2 }
 0x1b2   : > { %v1476_v33 = vpop.eup %1475  ;;  %v299_v41 = vadd.f32 %v298_v40, %v297_v39 }
 0x1b3   : > { %v1208_v35 = vmul.f32 %v1476_v33, %v1197_v34 }
 0x1b4   : > { %v300_v42 = vrot.slane %v299_v41, 1 }
 0x1b5   : > { %v1209_v36 = vsel %vm292_vm14, %v1208_v35, 0.0 }
 0x1b6   : > { %1210 = vadd.xlane.f32.xlu0 %v1209_v36  ;;  %v301_v43 = vadd.f32 %v300_v42, %v299_v41 }
 0x1b8   : > { %1401 = vpush %v301_v43 }
 0x1e9   : > { %s1402_s22 = spop %1401 }
 0x1ea   : > { %v1202_v45 = vstv %s1402_s22 }
 0x1eb   : > { %v1203_v46 = vadd.f32 %v1202_v45, %v1201_v44 }
 0x1ed   : > { %1205 = vst.msk [vmem:[#allocation2] sm:$0x1] %vm1204_vm15, %v1203_v46 }
 0x1f4   : > { %v1226_v59 = vld [vmem:[#allocation2] sm:$0x1] (!%p1340_p6) }
 0x1f5   : > { %v1227_v61 = vmul.f32 (!%p1340_p6), 0.0625, %v1226_v59 }
 0x243   : > { %v1211_v47 = vpop.xlane.xlu0 %1210 }
 0x244   : > { %v1212_v48 = vrot.slane %v1211_v47, 4 }
 0x246   : > { %v1213_v49 = vadd.f32 %v1212_v48, %v1211_v47 }
 0x248   : > { %v1214_v50 = vrot.slane %v1213_v49, 2 }
 0x24a   : > { %v1215_v51 = vadd.f32 %v1214_v50, %v1213_v49 }
 0x24c   : > { %v1216_v52 = vrot.slane %v1215_v51, 1 }
 0x24e   : > { %v1217_v53 = vadd.f32 %v1216_v52, %v1215_v51 }
 0x250   : > { %1403 = vpush %v1217_v53 }
 0x27f   : > { %1225 = sbr.rel (%p1340_p6) target bundleno = 673 (0x2a1), region = 48 }
 0x281   : > { %s1404_s25 = spop %1403 }
 0x282   : > { %v1219_v55 = vstv %s1404_s25 }
 0x283   : > { %v1220_v56 = vadd.f32 %v1219_v55, %v1206_v54 }
 0x285   : > { %1221 = vst.msk [vmem:[#allocation3] sm:$0x1] %vm1204_vm15, %v1220_v56 }
 0x28c   : > { %v1228_v57 = vld [vmem:[#allocation3] sm:$0x1] }
 0x28d   : > { %v1229_v58 = vmul.f32 0.0625, %v1228_v57 }
 0x28f   : > { %1477 = vlog2.f32 %v1229_v58 }
 0x299   : > { %v1478_v60 = vpop.eup %1477 }
 0x29a   : > { %v1231_v17 = vmul.f32 0.6931472, %v1478_v60 }
 0x29c   : > { %v1232_v62 = vsub.f32 0.0, %v1231_v17 }
 0x29e   : > { %v1233_v63 = vadd.f32 %v1232_v62, %v1227_v61 }
 0x2a0   : > { %1234 = vst.msk [vmem:[#allocation4] sm:$0x1] %vm1204_vm15, %v1233_v63 }
 0x2a1 PF: > { %p1409_p7 = scmp.eq.s32.totalorder %s1558_s19, 1  ;;  %s1521_s26 = smov [#allocation4]  }
 0x2a2   : > { %s1242_s27 = sshll.u32 %s1521_s26, 4  ;;  %s1243_s27 = int_to_ptr.vmem [resolvable:$true] %s1242_s27 }
 0x2a3   : > { %s1479_s28 = scalar_lea.vmem %s1243_s27, 16  ;;  %s1485_s29 = scalar_lea.vmem %s1243_s27, 32 }
 0x2a4   : > { %p1480_p8 = scmp.ne.s32.totalorder %s1243_s27, %s1479_s28  ;;  %p1486_p11 = scmp.lt.s32.totalorder %s1243_s27, %s1243_s27 }
 0x2a5   : > { %p1487_p12 = scmp.lt.s32.totalorder %s1485_s29, %s1479_s28 }
 0x2a6   : > { %p1481_p9 = pnand %p1480_p8, %p1409_p7 }
 0x2a7   : > { %p1488_p13 = por %p1487_p12, %p1486_p11 }
 0x2a8   : > { %p1482_p10 = pneg %p1481_p9 }
 0x2aa   : > { %p1489_p0 = pnand %p1488_p13, %p1482_p10 }
 0x2ac   : > { %1492 = shalt.err (!%p1489_p0)
}
 0x2ad   : > { %s1493_s7 = scalar_lea.hbm %s1746_s5, 16 }
 0x2ae   : > { %p1494_p1 = scmp.ne.s32.totalorder %s1746_s5, %s1493_s7  ;;  %p1499_p4 = scmp.lt.u32.totalorder %s1493_s7, %s1746_s5 }
 0x2b0   : > { %p1495_p2 = pnand %p1494_p1, %p1409_p7 }
 0x2b2   : > { %p1496_p3 = pneg %p1495_p2 }
 0x2b4   : > { %p1501_p5 = pnand %p1499_p4, %p1496_p3 }
 0x2b6   : > { %1504 = shalt.err (!%p1501_p5)
}
 0x2b7   : > { %1406 = dma.vmem_to_hbm [thread:$0]  (%p1409_p7), %s1243_s27, 16, %s1746_s5, [#allocation5]  }
 0x2b8   : > { %1510 = dma.done.wait (%p1409_p7), [#allocation5], 16  }
 0x2b9   : > { %1512 = vsyncadd (%p1409_p7), [#allocation5], 4294967280 }
 0x2ba PF: > { %s16_s18 = sadd.s32 1, %s1515_s18  }
 0x2bb   : > { %p13_p6 = scmp.ge.s32.totalorder %s16_s18, 4  }
 0x2bd   :  { %15 = sbr.rel (!%p13_p6) target bundleno = 1 (0x1), region = 87 }
 0x2c4   :  { %1255 = vsyncpa [#allocation5], 1 }
 0x2c5   :  { %1257 = vsyncpa [#allocation5 + $0x1], 1 }

</bundles_post_ra>
